<compile_context>
chip_gen: v6e
topology: v6e:2x2x1
jax: 0.10.0
libtpu: 0.0.40
codegen_flags: <defaults>
</compile_context>

<pallas_src>
import functools

import numpy as np

import jax
import jax.numpy as jnp
from jax.experimental import pallas as pl
from jax.experimental.pallas import tpu as pltpu


# ---------------------------------------------------------------------------
# Host-side constants (cached; never O(H^2 W^2))
# ---------------------------------------------------------------------------

@functools.lru_cache(maxsize=None)
def _pool_factors(h, w, k, method):
    """Separable pooling factors: ph (Ho, h) applied on H, pwt (w, Wo) on W."""
    ho, wo = h // k, w // k
    if method == "nearest":
        ph = (np.arange(h)[None, :] == np.arange(ho)[:, None] * k).astype(np.float32)
        pwt = (np.arange(w)[:, None] == np.arange(wo)[None, :] * k).astype(np.float32)
    else:  # bilinear (align_corners=False) / area at 0.5**n == k-wide mean
        ph = ((np.arange(h)[None, :] // k) == np.arange(ho)[:, None]).astype(np.float32) / k
        pwt = ((np.arange(w)[:, None] // k) == np.arange(wo)[None, :]).astype(np.float32) / k
    return ph, pwt


def _largest_divisor_leq(n, cap):
    cap = int(max(1, min(n, cap)))
    for d in range(cap, 0, -1):
        if n % d == 0:
            return d
    return 1


def _tile_cap(n, plane_bytes, budget_bytes=2 << 20):
    """Planes per block: ~2 MiB of input per block, and >=2 grid steps if possible
    so dimension_semantics=('parallel',) can spread work over v7x's two TCs."""
    cap = max(1, budget_bytes // max(1, plane_bytes))
    if n >= 2:
        cap = min(cap, max(1, n // 2))
    return cap


# ---------------------------------------------------------------------------
# Kernels
# ---------------------------------------------------------------------------

def _pool_kernel(x_ref, pwt_ref, ph_ref, o_ref):
    """Separable k x k pool.

    x: (T, H, W)   pwt: (T, W, Wo)   ph: (T, Ho, H)   o: (T, Ho, Wo)
    """
    y1 = jnp.einsum("nhw,nwv->nhv", x_ref[...], pwt_ref[...],
                    preferred_element_type=jnp.float32)            # W-pool (MXU)
    out = jnp.einsum("noh,nhv->nov", ph_ref[...], y1.astype(x_ref.dtype),
                     preferred_element_type=jnp.float32)            # H-pool (MXU)
    o_ref[...] = out.astype(o_ref.dtype)


def _remap_accumulate(pooled, wmap_ref, bias_ref, o_ref):
    """1x1-conv channel remap as a small unrolled VPU reduction over C.

    pooled: (C, Ho, Wo) f32   wmap: (C, Cout, 1, 1)   bias: (Cout, 1, 1)
    o: (1, Cout, Ho, Wo)
    """
    c_in = pooled.shape[0]
    acc = jnp.zeros(o_ref.shape[1:], jnp.float32)
    for c in range(c_in):  # C is small (3-4): fully unrolled multiply-accumulate
        acc = acc + wmap_ref[c].astype(jnp.float32) * pooled[c][None, :, :]
    acc = acc + bias_ref[...].astype(jnp.float32)
    o_ref[0] = acc.astype(o_ref.dtype)


def _make_remap_kernel(do_pool):
    if do_pool:
        def kernel(x_ref, pwt_ref, ph_ref, wmap_ref, bias_ref, o_ref):
            xv = x_ref[0]                                           # (C, H, W)
            y1 = jnp.einsum("chw,cwv->chv", xv, pwt_ref[...],
                            preferred_element_type=jnp.float32)
            pooled = jnp.einsum("coh,chv->cov", ph_ref[...], y1.astype(xv.dtype),
                                preferred_element_type=jnp.float32)
            _remap_accumulate(pooled, wmap_ref, bias_ref, o_ref)
    else:
        def kernel(x_ref, wmap_ref, bias_ref, o_ref):
            pooled = x_ref[0].astype(jnp.float32)                   # n_stages == 0
            _remap_accumulate(pooled, wmap_ref, bias_ref, o_ref)
    return kernel


# ---------------------------------------------------------------------------
# Wrapper
# ---------------------------------------------------------------------------

def spatial_rescaler(x, *, n_stages=1, method="bilinear", multiplier=0.5,
                     channel_map_weight=None, channel_map_bias=None):
    """SpatialRescaler.forward.  x: (B, C, H, W) -> (B, C[out], H/2^n, W/2^n)."""
    assert n_stages >= 0
    assert method in ["nearest", "linear", "bilinear", "trilinear", "bicubic", "area"]
    if method not in ("nearest", "bilinear", "area") or abs(multiplier - 0.5) > 1e-12:
        # TODO(synk): general multipliers / bicubic / (tri)linear need true
        # resampling weights; only the module-default 0.5x nearest/bilinear/area
        # paths are expressed as separable constant pooling factors here.
        raise NotImplementedError("only multiplier=0.5 with nearest/bilinear/area")
    assert x.ndim == 4
    B, C, H, W = x.shape
    k = 2 ** n_stages
    do_pool = n_stages > 0
    if do_pool:
        # n successive 0.5x stages == one 2^n pool only if every size stays even.
        assert H % k == 0 and W % k == 0, "H, W must be divisible by 2**n_stages"
    Ho, Wo = H // k, W // k
    parallel = pltpu.CompilerParams(dimension_semantics=("parallel",))

    # ---------------- pool-only path ----------------
    if channel_map_weight is None:
        if not do_pool:
            return x
        N = B * C
        itemsize = np.dtype(x.dtype).itemsize
        T = _largest_divisor_leq(N, _tile_cap(N, H * W * itemsize))
        ph, pwt = _pool_factors(H, W, k, method)
        ph_b = jnp.asarray(np.broadcast_to(ph, (T, Ho, H)), dtype=x.dtype)
        pwt_b = jnp.asarray(np.broadcast_to(pwt, (T, W, Wo)), dtype=x.dtype)
        xf = x.reshape(N, H, W)                 # free contiguous reshape
        out = pl.pallas_call(
            _pool_kernel,
            out_shape=jax.ShapeDtypeStruct((N, Ho, Wo), x.dtype),
            grid=(N // T,),
            in_specs=[
                pl.BlockSpec((T, H, W), lambda i: (i, 0, 0)),
                pl.BlockSpec((T, W, Wo), lambda i: (0, 0, 0)),
                pl.BlockSpec((T, Ho, H), lambda i: (0, 0, 0)),
            ],
            out_specs=pl.BlockSpec((T, Ho, Wo), lambda i: (i, 0, 0)),
            compiler_params=parallel,
        )(xf, pwt_b, ph_b)
        return out.reshape(B, C, Ho, Wo)

    # ---------------- fused pool + 1x1-conv remap path ----------------
    cout = channel_map_weight.shape[0]
    w2 = channel_map_weight.reshape(cout, -1).astype(jnp.float32)   # (Cout, C)
    assert w2.shape[1] == C
    wmap_b = w2.T.reshape(C, cout, 1, 1)                            # per-c column
    if channel_map_bias is None:
        bias_b = jnp.zeros((cout, 1, 1), jnp.float32)
    else:
        bias_b = channel_map_bias.reshape(cout).astype(jnp.float32).reshape(cout, 1, 1)

    operands = [x]
    in_specs = [pl.BlockSpec((1, C, H, W), lambda i: (i, 0, 0, 0))]
    if do_pool:
        ph, pwt = _pool_factors(H, W, k, method)
        ph_b = jnp.asarray(np.broadcast_to(ph, (C, Ho, H)), dtype=x.dtype)
        pwt_b = jnp.asarray(np.broadcast_to(pwt, (C, W, Wo)), dtype=x.dtype)
        operands += [pwt_b, ph_b]
        in_specs += [pl.BlockSpec((C, W, Wo), lambda i: (0, 0, 0)),
                     pl.BlockSpec((C, Ho, H), lambda i: (0, 0, 0))]
    operands += [wmap_b, bias_b]
    in_specs += [pl.BlockSpec((C, cout, 1, 1), lambda i: (0, 0, 0, 0)),
                 pl.BlockSpec((cout, 1, 1), lambda i: (0, 0, 0))]

    out = pl.pallas_call(
        _make_remap_kernel(do_pool),
        out_shape=jax.ShapeDtypeStruct((B, cout, Ho, Wo), x.dtype),
        grid=(B,),                              # one batch element per step
        in_specs=in_specs,
        out_specs=pl.BlockSpec((1, cout, Ho, Wo), lambda i: (i, 0, 0, 0)),
        compiler_params=parallel,
    )(*operands)
    return out


# ---------------------------------------------------------------------------
# Main
# ---------------------------------------------------------------------------

if __name__ == "__main__":
    key = jax.random.PRNGKey(0)
    kx, kw = jax.random.split(key)

    B, C, H, W = 2, 4, 16, 16
    n_stages = 1
    x = jax.random.normal(kx, (B, C, H, W), jnp.float32)

    # 1) Default config: n_stages=1, bilinear 0.5x, no channel remap.
    out = jax.jit(lambda v: spatial_rescaler(v, n_stages=n_stages))(x)
    out = jax.block_until_ready(out)
    assert out.shape == (B, C, H // 2, W // 2)
    ref = x.reshape(B, C, H // 2, 2, W // 2, 2).mean(axis=(3, 5))
    assert jnp.allclose(out, ref, atol=1e-5, rtol=1e-5), "bilinear rescale mismatch"

    # 2) nearest 0.5x.
    out_n = jax.jit(lambda v: spatial_rescaler(v, n_stages=1, method="nearest"))(x)
    out_n = jax.block_until_ready(out_n)
    ref_n = x[:, :, ::2, ::2]
    assert jnp.allclose(out_n, ref_n, atol=1e-6, rtol=1e-6), "nearest rescale mismatch"

    # 3) remap_output config: fused 1x1 conv to 8 channels (bias=False, module default).
    Cout = 8
    wmap = jax.random.normal(kw, (Cout, C), jnp.float32) * 0.1
    out2 = jax.jit(lambda v, w: spatial_rescaler(v, n_stages=n_stages,
                                                 channel_map_weight=w))(x, wmap)
    out2 = jax.block_until_ready(out2)
    assert out2.shape == (B, Cout, H // 2, W // 2)
    ref2 = jnp.einsum("oc,bchw->bohw", wmap, ref)
    assert jnp.allclose(out2, ref2, atol=1e-4, rtol=1e-4), "remap mismatch"

    print("KERNEL_OK")
</pallas_src>

<mosaic_0001>
module attributes {stable_mosaic.version = 11 : i64} {
  func.func @_pool_kernel(%arg0: i32, %arg1: memref<4x16x16xf32, #tpu.memory_space<vmem>>, %arg2: memref<4x16x8xf32, #tpu.memory_space<vmem>>, %arg3: memref<4x8x16xf32, #tpu.memory_space<vmem>>, %arg4: memref<4x8x8xf32, #tpu.memory_space<vmem>>) attributes {dimension_semantics = [#tpu.dimension_semantics<parallel>], iteration_bounds = array<i64: 2>, scalar_prefetch = 0 : i64, scratch_operands = 0 : i64, tpu.core_type = #tpu.core_type<tc>, window_params = [{transform_indices = @transform_0, window_bounds = array<i64: 4, 16, 16>}, {pipeline_mode = #tpu.pipeline_mode<synchronous>, transform_indices = @transform_1, window_bounds = array<i64: 4, 16, 8>}, {pipeline_mode = #tpu.pipeline_mode<synchronous>, transform_indices = @transform_2, window_bounds = array<i64: 4, 8, 16>}, {transform_indices = @transform_3, window_bounds = array<i64: 4, 8, 8>}]} {
    %c0 = arith.constant 0 : index
    %c0_0 = arith.constant 0 : index
    %c0_1 = arith.constant 0 : index
    %0 = vector.load %arg1[%c0, %c0_0, %c0_1] : memref<4x16x16xf32, #tpu.memory_space<vmem>>, vector<4x16x16xf32>
    %c0_2 = arith.constant 0 : index
    %c0_3 = arith.constant 0 : index
    %c0_4 = arith.constant 0 : index
    %1 = vector.load %arg2[%c0_2, %c0_3, %c0_4] : memref<4x16x8xf32, #tpu.memory_space<vmem>>, vector<4x16x8xf32>
    "tpu.trace_start"() <{level = 10 : i32, message = "nhw,nwv->nhv"}> : () -> ()
    %cst = arith.constant dense<0.000000e+00> : vector<4x16x8xf32>
    %2 = tpu.matmul %0, %1, %cst {dimension_numbers = #tpu.dot_dimension_numbers<[2], [1], [1], [2], [0, 0, 0, 1, 1, 2], [0], [0]>} : vector<4x16x16xf32>, vector<4x16x8xf32>, vector<4x16x8xf32> -> vector<4x16x8xf32>
    "tpu.trace_stop"() : () -> ()
    %c0_5 = arith.constant 0 : index
    %c0_6 = arith.constant 0 : index
    %c0_7 = arith.constant 0 : index
    %3 = vector.load %arg3[%c0_5, %c0_6, %c0_7] : memref<4x8x16xf32, #tpu.memory_space<vmem>>, vector<4x8x16xf32>
    "tpu.trace_start"() <{level = 10 : i32, message = "noh,nhv->nov"}> : () -> ()
    %cst_8 = arith.constant dense<0.000000e+00> : vector<4x8x8xf32>
    %4 = tpu.matmul %3, %2, %cst_8 {dimension_numbers = #tpu.dot_dimension_numbers<[2], [1], [1], [2], [0, 0, 0, 1, 1, 2], [0], [0]>} : vector<4x8x16xf32>, vector<4x16x8xf32>, vector<4x8x8xf32> -> vector<4x8x8xf32>
    "tpu.trace_stop"() : () -> ()
    %c0_9 = arith.constant 0 : index
    %c0_10 = arith.constant 0 : index
    %c0_11 = arith.constant 0 : index
    %5 = vector.load %arg4[%c0_9, %c0_10, %c0_11] : memref<4x8x8xf32, #tpu.memory_space<vmem>>, vector<4x8x8xf32>
    tpu.vector_store %arg4[%c0_9, %c0_10, %c0_11], %4 {strides = array<i32>} : memref<4x8x8xf32, #tpu.memory_space<vmem>>, vector<4x8x8xf32>,
    return
  }
  func.func @transform_0(%arg0: i32) -> (i32, i32, i32) {
    %c0_i32 = arith.constant 0 : i32
    %c0_i32_0 = arith.constant 0 : i32
    %c0_i32_1 = arith.constant 0 : i32
    return %arg0, %c0_i32, %c0_i32_0 : i32, i32, i32
  }
  func.func @transform_1(%arg0: i32) -> (i32, i32, i32) {
    %c0_i32 = arith.constant 0 : i32
    %c0_i32_0 = arith.constant 0 : i32
    %c0_i32_1 = arith.constant 0 : i32
    %c0_i32_2 = arith.constant 0 : i32
    return %c0_i32, %c0_i32_0, %c0_i32_1 : i32, i32, i32
  }
  func.func @transform_2(%arg0: i32) -> (i32, i32, i32) {
    %c0_i32 = arith.constant 0 : i32
    %c0_i32_0 = arith.constant 0 : i32
    %c0_i32_1 = arith.constant 0 : i32
    %c0_i32_2 = arith.constant 0 : i32
    return %c0_i32, %c0_i32_0, %c0_i32_1 : i32, i32, i32
  }
  func.func @transform_3(%arg0: i32) -> (i32, i32, i32) {
    %c0_i32 = arith.constant 0 : i32
    %c0_i32_0 = arith.constant 0 : i32
    %c0_i32_1 = arith.constant 0 : i32
    return %arg0, %c0_i32, %c0_i32_0 : i32, i32, i32
  }
}

</mosaic_0001>

<bundles_post_ra>
// kernel: _lambda_.1
= control target key start
LH: loop header
LB: loop body
LE: loop exit
PB: predicated region body
PF: predicated region fallthrough
CT: control target
= control target key end

     0   :  { %8 = vsyncpa [#allocation3], 0  ;;  %s1426_s0 = inlined_call_operand.hbm [shape: f32[8,16,16], index: 0, kind: input, shape index: {}]   ;;  %s1427_s1 = inlined_call_operand.vmem [shape: f32[4,16,8], index: 1, kind: input, shape index: {}]   ;;  %s1428_s2 = inlined_call_operand.vmem [shape: f32[4,8,16], index: 2, kind: input, shape index: {}]   ;;  %s1429_s3 = inlined_call_operand.hbm [shape: f32[8,8,8], index: 3, kind: output, shape index: {}]  }
   0x1   :  { %10 = vsyncpa [#allocation3 + $0x1], 0 }
   0x2   :  { %11 = vsyncpa [#allocation4], 0 }
   0x3   :  { %13 = vsyncpa [#allocation4 + $0x1], 0  ;;  %s1209_s12 = smov 0   ;;  %s1211_s13 = smov 0  }
   0x4   :  { %s1213_s14 = smov 0   ;;  %s1215_s15 = smov 0  }
   0x5 LB: > { %s1230_s16 = sadd.s32 4294967295, %s1179_s15   ;;  %s921_s17 = sadd.s32 4294967294, %s1179_s15   ;;  %s1179_s15 = sphi %s1215_s15, %s1444_s15   ;;  %s1175_s14 = sphi %s1213_s14, %s1443_s14   ;;  %s1171_s13 = sphi %s1211_s13, %s1442_s13   ;;  %s1167_s12 = sphi %s1209_s12, %s1441_s12  }
   0x6   : > { %s1234_s18 = sadd.s32 1, %s1179_s15   ;;  %s26_s19 = sadd.s32 1, %s1175_s14 }
   0x7   : > { %s23_s20 = ssub.s32 %s1179_s15, %s1234_s18  ;;  %p33_p0 = scmp.ne.s32.totalorder %s1175_s14, %s1171_s13 }
   0x8   : > { %p24_p1 = scmp.eq.s32.totalorder %s23_s20, 0  ;;  %p34_p2 = scmp.eq.s32.totalorder %s1179_s15, 0 }
   0x9   : > { %p39_p3 = scmp.ne.s32.totalorder %s1171_s13, %s1167_s12  ;;  %p40_p4 = scmp.eq.s32.totalorder %s1230_s16, 0 }
   0xa   : > { %s1246_s21 = scalar_select %p24_p1, %s1175_s14, %s26_s19  }
   0xb   : > { %p1248_p5 = por %p34_p2, %p33_p0  ;;  %p1252_p6 = por %p40_p4, %p39_p3 }
   0xc   : > { %p105_p7 = scmp.eq.s32.totalorder %s1230_s16, 1  ;;  %p111_p8 = scmp.eq.s32.totalorder %s921_s17, 1 }
   0xd   : > { %s1433_s23 = scalar_select %p1252_p6, 1, 0 }
   0xe   : > { %p1047_p10 = scmp.lt.s32.totalorder %s1179_s15, 2  ;;  %p1259_p11 = por %p105_p7, %p33_p0 }
   0xf   : > { %p1263_p12 = por %p111_p8, %p39_p3  ;;  %s137_s26 = sand.u32 1, %s1175_s14  }
  0x10   : > { %s1434_s24 = scalar_select %p1259_p11, 1, 0 }
  0x11   : > { %s1435_s25 = scalar_select %p1263_p12, 1, 0 }
  0x12   : > { %s949_s27 = sshll.u32 %s1179_s15, 10  ;;  %s924_s28 = sshll.u32 %s137_s26, 6 }
  0x13   : > { %s1272_s4 = scalar_lea.hbm %s1426_s0, %s949_s27  ;;  %s141_s5 = scalar_lea.vmem [#allocation2], %s924_s28 }
  0x14   : > { %s149_s6 = sshll.u32 %s141_s5, 4  ;;  %p1276_p13 = pnand %p1047_p10, %p1248_p5  ;;  %s1280_s6 = int_to_ptr.vmem [resolvable:$true] %s149_s6 }
  0x15   : > { %s1282_s8 = scalar_lea.sflag [#allocation3], %s137_s26  ;;  %s1087_s9 = scalar_lea.hbm %s1272_s4, 1024 }
  0x16   : > { %p1088_p0 = scmp.ne.s32.totalorder %s1272_s4, %s1087_s9  ;;  %p1089_p1 = pneg %p1276_p13 }
  0x17   : > { %s1092_s17 = scalar_lea.hbm %s1426_s0, 2048  ;;  %p1093_p4 = scmp.lt.s32.totalorder %s1272_s4, %s1426_s0 }
  0x18   : > { %p1090_p2 = pnand %p1089_p1, %p1088_p0  ;;  %p1094_p5 = scmp.lt.s32.totalorder %s1092_s17, %s1087_s9 }
  0x1a   : > { %p1091_p3 = pneg %p1090_p2  ;;  %p1095_p7 = por %p1094_p5, %p1093_p4 }
  0x1c   : > { %p1096_p8 = pnand %p1095_p7, %p1091_p3 }
  0x1e   : > { %1099 = shalt.err (!%p1096_p8)
}
  0x1f   : > { %s1100_s22 = scalar_lea.vmem %s1280_s6, 1024  ;;  %s1181_s26 = smov [#allocation2]  }
  0x20   : > { %p1101_p10 = scmp.ne.s32.totalorder %s1280_s6, %s1100_s22  ;;  %s1105_s27 = sshll.u32 %s1181_s26, 4  ;;  %s1106_s27 = int_to_ptr.vmem [resolvable:$false] %s1105_s27 }
  0x21   : > { %s1107_s28 = scalar_lea.vmem %s1106_s27, 2048  ;;  %p1108_p2 = scmp.lt.s32.totalorder %s1280_s6, %s1106_s27 }
  0x22   : > { %p1103_p9 = pnand %p1101_p10, %p1089_p1  ;;  %p1109_p12 = scmp.lt.s32.totalorder %s1107_s28, %s1100_s22 }
  0x24   : > { %p1104_p0 = pneg %p1103_p9  ;;  %p1110_p11 = por %p1109_p12, %p1108_p2 }
  0x26   : > { %p1111_p6 = pnand %p1110_p11, %p1104_p0 }
  0x28   : > { %1114 = shalt.err (!%p1111_p6)
}
  0x29   : > { %s1182_s29 = smov 128   ;;  %s1183_s30 = smov 8  }
  0x2a   : > { %1042 = dma.hbm_to_vmem [thread:$0]  (!%p1276_p13), %s1272_s4, 1024, %s1280_s6, %s1282_s8, %s1182_s29, %s1182_s29, %s1183_s30  }
  0x2b   : > { %p928_p9 = scmp.ge.s32.totalorder %s1179_s15, 1  ;;  %p157_p1 = scmp.lt.s32.totalorder %s1179_s15, 3 }
  0x2d   : > { %p158_p3 = pnand %p928_p9, %p157_p1 }
  0x2e   : > { %s1306_s5 = sand.u32 (!%p158_p3), 1, %s1171_s13   ;;  %p1437_p6 = scmp.ne.s32.totalorder (!%p158_p3), %s1433_s23, 0 }
  0x2f   : > { %161 = sbr.rel (%p158_p3) target bundleno = 469 (0x1d5), region = 32  ;;  %s929_s9 = sshll.u32 (!%p158_p3), %s1306_s5, 6 }
  0x30   : > { %s164_s10 = scalar_lea.sflag (!%p158_p3), [#allocation3], %s1306_s5  ;;  %s1310_s11 = scalar_lea.vmem (!%p158_p3), [#allocation2], %s929_s9 }
  0x34   : > { %1158 = dma.done.wait (%p1437_p6), %s164_s10, 1024  }
  0x35   : > { %1160 = vsyncadd (%p1437_p6), %s164_s10, 4294966272  ;;  %v201_v0 = vld [vmem:[%s1427_s1 + $0x8] sm:$0xff]  ;;  %v203_v1 = vld [vmem:[%s1427_s1 + $0x18] sm:$0xff]  ;;  %vm208_vm0 = vcmask 130048   ;;  %v1184_v16 = vmov 0.0   ;;  %vm1185_vm1 = vmmov 0  }
  0x36   : > { %v200_v2 = vld [vmem:[%s1427_s1] sm:$0xff]  ;;  %979 = vmatprep.subr.mxu0 %v201_v0  ;;  %986 = vmatprep.subr.mxu1 %v203_v1  ;;  %v202_v3 = vld [vmem:[%s1427_s1 + $0x10] sm:$0xff]  ;;  %v193_v6 = vld [vmem:[%s1310_s11 + $0x8] sm:$0xff]  ;;  %s930_s20 = sshll.u32 %s1306_s5, 5  ;;  %vm829_vm2 = vcmask 64512   ;;  %s950_s27 = sshll.u32 %s1230_s16, 9 }
  0x37   : > { %v192_v4 = vld [vmem:[%s1310_s11] sm:$0xff]  ;;  %980 = vmatpush3.msra.mxu0 %v201_v0  ;;  %987 = vmatpush3.msra.mxu1 %v203_v1  ;;  %v194_v5 = vld [vmem:[%s1310_s11 + $0x10] sm:$0xff]  ;;  %v195_v7 = vld [vmem:[%s1310_s11 + $0x18] sm:$0xff]  ;;  %s189_s22 = scalar_lea.vmem [#allocation5], %s930_s20  ;;  %s1383_s30 = scalar_lea.hbm %s1429_s3, %s950_s27 }
  0x38   : > { %981 = vmatprep.subr.mxu0 %v200_v2  ;;  %988 = vmatprep.subr.mxu1 %v202_v3  ;;  %v205_v8 = vld [vmem:[%s1427_s1 + $0x28] sm:$0xff]  ;;  %v207_v9 = vld [vmem:[%s1427_s1 + $0x38] sm:$0xff]  ;;  %v204_v10 = vld [vmem:[%s1427_s1 + $0x20] sm:$0xff]  ;;  %s848_s26 = sshll.u32 %s189_s22, 4  ;;  %s835_s9 = scalar_lea.sflag [#allocation4], %s1306_s5  ;;  %s1378_s26 = int_to_ptr.vmem [resolvable:$true] %s848_s26 }
  0x39   : > { %982 = vmatpush3.msra.mxu0 %v200_v2  ;;  %983 = vmatprep.mubr.msk.f32.mxu0 %vm208_vm0, %v192_v4  ;;  %v206_v11 = vld [vmem:[%s1427_s1 + $0x30] sm:$0xff]  ;;  %v196_v12 = vld [vmem:[%s1310_s11 + $0x20] sm:$0xff]  ;;  %v197_v14 = vld [vmem:[%s1310_s11 + $0x28] sm:$0xff]  ;;  %s1115_s16 = scalar_lea.vmem %s1378_s26, 512  ;;  %p1438_p12 = scmp.ne.s32.totalorder %s1434_s24, 0 }
  0x3a   : > { %989 = vmatpush3.msra.mxu1 %v202_v3  ;;  %990 = vmatprep.mubr.msk.f32.mxu1 %vm208_vm0, %v194_v5  ;;  %v198_v13 = vld [vmem:[%s1310_s11 + $0x30] sm:$0xff]  ;;  %v199_v15 = vld [vmem:[%s1310_s11 + $0x38] sm:$0xff]  ;;  %v533_v19 = vld [vmem:[%s1428_s2] sm:$0xff]  ;;  %p1116_p11 = scmp.ne.s32.totalorder %s1378_s26, %s1115_s16  ;;  %s1186_s10 = smov [#allocation5]  }
  0x3b   : > { %984 = vmatmul.mubr.msk.f32.vlgmr.msra.gmra.mxu0 %vm208_vm0, %v193_v6  ;;  %991 = vmatmul.mubr.msk.f32.vlgmr.msra.gmra.mxu1 %vm208_vm0, %v195_v7  ;;  %v534_v20 = vld [vmem:[%s1428_s2 + $0x8] sm:$0xff]  ;;  %v535_v25 = vld [vmem:[%s1428_s2 + $0x10] sm:$0xff]  ;;  %v536_v26 = vld [vmem:[%s1428_s2 + $0x18] sm:$0xff]  ;;  %s1119_s11 = sshll.u32 %s1186_s10, 4  ;;  %s1120_s11 = int_to_ptr.vmem [resolvable:$false] %s1119_s11 }
  0x3c   : > { %993 = vmatprep.subr.mxu0 %v205_v8  ;;  %1000 = vmatprep.subr.mxu1 %v207_v9  ;;  %p1117_p13 = pnand %p1116_p11, %p1438_p12  ;;  %s1121_s4 = scalar_lea.vmem %s1120_s11, 1024 }
  0x3d   : > { %994 = vmatpush3.msra.mxu0 %v205_v8  ;;  %1001 = vmatpush3.msra.mxu1 %v207_v9  ;;  %p1122_p5 = scmp.lt.s32.totalorder %s1378_s26, %s1120_s11  ;;  %p1123_p7 = scmp.lt.s32.totalorder %s1121_s4, %s1115_s16 }
  0x3e   : > { %995 = vmatprep.subr.mxu0 %v204_v10  ;;  %1002 = vmatprep.subr.mxu1 %v206_v11  ;;  %p1118_p4 = pneg %p1117_p13 }
  0x3f   : > { %996 = vmatpush3.msra.mxu0 %v204_v10  ;;  %997 = vmatprep.mubr.msk.f32.mxu0 %vm208_vm0, %v196_v12  ;;  %p1124_p8 = por %p1123_p7, %p1122_p5 }
  0x40   : > { %1003 = vmatpush3.msra.mxu1 %v206_v11  ;;  %1004 = vmatprep.mubr.msk.f32.mxu1 %vm208_vm0, %v198_v13 }
  0x41   : > { %998 = vmatmul.mubr.msk.f32.vlgmr.msra.gmra.mxu0 %vm208_vm0, %v197_v14  ;;  %1005 = vmatmul.mubr.msk.f32.vlgmr.msra.gmra.mxu1 %vm208_vm0, %v199_v15  ;;  %p1125_p10 = pnand %p1124_p8, %p1118_p4 }
  0x42   : > { %1007 = vmatprep.subr.mxu0 %v1184_v16  ;;  %1014 = vmatprep.subr.mxu1 %v1184_v16 }
  0x43   : > { %1011 = vmatprep.mubr.msk.f32.mxu0 %vm1185_vm1, %v1184_v16  ;;  %1018 = vmatprep.mubr.msk.f32.mxu1 %vm1185_vm1, %v1184_v16 }
  0xfb   : > { %v985_v17 = vpop.f32.mrf.mxu0  ;;  %v992_v18 = vpop.f32.mrf.mxu1 }
  0xfc   : > { %1008 = vmatpush3.msra.mxu0 %v985_v17  ;;  %1015 = vmatpush3.msra.mxu1 %v992_v18 }
  0xfd   : > { %v281_v21 = vpop.f32.mrf.mxu0  ;;  %v362_v22 = vpop.f32.mrf.mxu1  ;;  %1009 = vmatprep.subr.mxu0 %v1184_v16  ;;  %1016 = vmatprep.subr.mxu1 %v1184_v16 }
  0xfe   : > { %1010 = vmatpush3.msra.mxu0 %v281_v21  ;;  %1017 = vmatpush3.msra.mxu1 %v362_v22 }
  0xff   : > { %1012 = vmatmul.mubr.msk.f32.vlgmr.msra.gmra.mxu0 %vm208_vm0, %v533_v19  ;;  %1019 = vmatmul.mubr.msk.f32.vlgmr.msra.gmra.mxu1 %vm208_vm0, %v534_v20 }
 0x100   : > { %1021 = vmatprep.subr.mxu0 %v1184_v16  ;;  %1028 = vmatprep.subr.mxu1 %v1184_v16 }
 0x101   : > { %v999_v23 = vpop.f32.mrf.mxu0  ;;  %v1006_v24 = vpop.f32.mrf.mxu1  ;;  %1025 = vmatprep.mubr.msk.f32.mxu0 %vm1185_vm1, %v1184_v16  ;;  %1032 = vmatprep.mubr.msk.f32.mxu1 %vm1185_vm1, %v1184_v16 }
 0x102   : > { %1022 = vmatpush3.msra.mxu0 %v999_v23  ;;  %1029 = vmatpush3.msra.mxu1 %v1006_v24 }
 0x103   : > { %v443_v27 = vpop.f32.mrf.mxu0  ;;  %v524_v28 = vpop.f32.mrf.mxu1  ;;  %1023 = vmatprep.subr.mxu0 %v1184_v16  ;;  %1030 = vmatprep.subr.mxu1 %v1184_v16 }
 0x104   : > { %1024 = vmatpush3.msra.mxu0 %v443_v27  ;;  %1031 = vmatpush3.msra.mxu1 %v524_v28 }
 0x105   : > { %1026 = vmatmul.mubr.msk.f32.vlgmr.msra.gmra.mxu0 %vm208_vm0, %v535_v25  ;;  %1033 = vmatmul.mubr.msk.f32.vlgmr.msra.gmra.mxu1 %vm208_vm0, %v536_v26 }
 0x1bf   : > { %v606_v29 = vpop.f32.mrf.mxu0  ;;  %v679_v30 = vpop.f32.mrf.mxu1 }
 0x1c0   : > { %830 = vst.msk [vmem:[%s189_s22] sm:$0xff] %vm829_vm2, %v606_v29  ;;  %831 = vst.msk [vmem:[%s189_s22 + $0x8] sm:$0xff] %vm829_vm2, %v679_v30 }
 0x1c1   : > { %v1013_v31 = vpop.f32.mrf.mxu0  ;;  %v1020_v32 = vpop.f32.mrf.mxu1 }
 0x1c5   : > { %v752_v33 = vpop.f32.mrf.mxu0  ;;  %v825_v34 = vpop.f32.mrf.mxu1 }
 0x1c6   : > { %832 = vst.msk [vmem:[%s189_s22 + $0x10] sm:$0xff] %vm829_vm2, %v752_v33  ;;  %833 = vst.msk [vmem:[%s189_s22 + $0x18] sm:$0xff] %vm829_vm2, %v825_v34 }
 0x1c7   : > { %v1027_v35 = vpop.f32.mrf.mxu0  ;;  %v1034_v36 = vpop.f32.mrf.mxu1 }
 0x1c8   : > { %1128 = shalt.err (!%p1125_p10)
}
 0x1c9   : > { %s1129_s6 = scalar_lea.hbm %s1383_s30, 512  ;;  %s1133_s17 = scalar_lea.hbm %s1429_s3, 1024 }
 0x1ca   : > { %p1130_p0 = scmp.ne.s32.totalorder %s1383_s30, %s1129_s6  ;;  %p1134_p1 = scmp.lt.s32.totalorder %s1383_s30, %s1429_s3 }
 0x1cb   : > { %p1135_p3 = scmp.lt.s32.totalorder %s1133_s17, %s1129_s6 }
 0x1cc   : > { %p1131_p2 = pnand %p1130_p0, %p1438_p12 }
 0x1cd   : > { %p1136_p6 = por %p1135_p3, %p1134_p1 }
 0x1ce   : > { %p1132_p9 = pneg %p1131_p2 }
 0x1d0   : > { %p1137_p11 = pnand %p1136_p6, %p1132_p9 }
 0x1d2   : > { %1140 = shalt.err (!%p1137_p11)
}
 0x1d3   : > { %s1187_s20 = smov 128   ;;  %s1188_s22 = smov 8  }
 0x1d4   : > { %1037 = dma.vmem_to_hbm [thread:$0]  (%p1438_p12), %s1378_s26, 512, %s1383_s30, %s835_s9, %s1187_s20, %s1187_s20, %s1188_s22  }
 0x1d5 PF: > { %s863_s27 = sand.u32 1, %s1167_s12   ;;  %p1439_p13 = scmp.ne.s32.totalorder %s1435_s25, 0 }
 0x1d6   : > { %p1440_p4 = scmp.ge.s32.totalorder %s1179_s15, 2  ;;  %s864_s28 = scalar_lea.sflag [#allocation4], %s863_s27 }
 0x1d8   : > { %p1044_p5 = pnand %p1440_p4, %p1439_p13 }
 0x1da   : > { %p1045_p7 = pneg %p1044_p5 }
 0x1dc   : > { %1162 = dma.done.wait (%p1045_p7), %s864_s28, 512  }
 0x1dd   : > { %1164 = vsyncadd (%p1045_p7), %s864_s28, 4294966784  ;;  %p16_p8 = scmp.ge.s32.totalorder %s1234_s18, 4   ;;  %s1441_s12 = smov %s1171_s13 }
 0x1de   : > { %s1442_s13 = smov %s1175_s14  ;;  %s1443_s14 = smov %s1246_s21 }
 0x1df   : > { %s1444_s15 = smov %s1234_s18  ;;  %18 = sbr.rel (!%p16_p8) target bundleno = 5 (0x5), region = 77 }
 0x1e4   :  { %869 = vsyncpa [#allocation3], 1 }
 0x1e5   :  { %871 = vsyncpa [#allocation3 + $0x1], 1 }
 0x1e6   :  { %872 = vsyncpa [#allocation4], 1 }
 0x1e7   :  { %874 = vsyncpa [#allocation4 + $0x1], 1 }

</bundles_post_ra>
